<compile_context>
chip_gen: v5e
topology: v5e:2x2
jax: 0.10.0
libtpu: 0.0.40
codegen_flags: <defaults>
</compile_context>

<pallas_src>
import functools

import jax
import jax.numpy as jnp
from jax.experimental import pallas as pl
from jax.experimental.pallas import tpu as pltpu


def _round_up(x, m):
    return ((x + m - 1) // m) * m


# --------------------------------------------------------------------------
# Pallas kernels
# --------------------------------------------------------------------------
def _mixup_batch_kernel(lam_ref, x_ref, out_ref):
    """out = lam * x + (1 - lam) * roll(x, 1, axis=0) for one (B, TD) tile.

    lam_ref : (1,)  f32 in SMEM (scalar prefetch)
    x_ref   : (B, TD) tile of the flattened image batch
    out_ref : (B, TD) mixed tile (same dtype as the input batch)
    """
    lam = lam_ref[0]
    x = x_ref[...].astype(jnp.float32)                      # (B, TD)
    B = x.shape[0]
    if B > 1:
        # roll by +1 along the batch (sublane) axis, entirely in VMEM
        x_rolled = jnp.concatenate([x[B - 1:B, :], x[:B - 1, :]], axis=0)
    else:
        x_rolled = x
    out_ref[...] = (lam * x + (1.0 - lam) * x_rolled).astype(out_ref.dtype)


def _mixup_target_kernel(lam_ref, tgt_ref, out_ref):
    """One-hot encode targets, then mix with the batch-rolled one-hot.

    lam_ref : (1,)  f32 in SMEM (scalar prefetch)
    tgt_ref : (B, 1) int32 class indices
    out_ref : (B, num_classes) mixed soft targets (batch dtype)
    """
    lam = lam_ref[0]
    B, NC = out_ref.shape
    t = tgt_ref[...]                                        # (B, 1) int32
    classes = jax.lax.broadcasted_iota(jnp.int32, (B, NC), 1)
    oh = (classes == t).astype(jnp.float32)                 # (B, NC) one-hot
    if B > 1:
        oh_rolled = jnp.concatenate([oh[B - 1:B, :], oh[:B - 1, :]], axis=0)
    else:
        oh_rolled = oh
    out_ref[...] = (lam * oh + (1.0 - lam) * oh_rolled).astype(out_ref.dtype)


# --------------------------------------------------------------------------
# host-side wrapper
# --------------------------------------------------------------------------
def _effective_lambda(key, p, alpha):
    """lam ~ Beta(alpha, alpha) if mixup fires (prob p), else exactly 1.0."""
    k_apply, k_lam = jax.random.split(key)
    u = jax.random.uniform(k_apply, (), jnp.float32)
    lam = jax.random.beta(k_lam, alpha, alpha, dtype=jnp.float32)
    # torch: `if torch.rand(1).item() >= p: return (batch, one_hot)`.
    # lam == 1.0 is the exact identity for both batch and one-hot target.
    return jnp.where(u < p, lam, jnp.float32(1.0))


def random_mixup(batch, target, key, *, num_classes, p=0.5, alpha=1.0,
                 max_block_bytes=4 * 1024 * 1024):
    """JAX/Pallas equivalent of RandomMixup.forward.

    batch : (B, C, H, W) float array
    target: (B,) integer class indices
    key   : jax PRNG key (replaces torch's global RNG)
    returns (mixed_batch (B,C,H,W), mixed_soft_targets (B, num_classes))
    """
    B, C, H, W = batch.shape
    D = C * H * W
    lam = _effective_lambda(key, p, alpha).reshape(1)

    # ---- image-batch path: flatten, pad feature dim to lane-dense tiles ----
    Dp = _round_up(D, 128)
    td_cap = max(128, (max_block_bytes // (B * 4)) // 128 * 128)
    TD = min(Dp, td_cap)                   # tile width (multiple of 128)
    Dp = _round_up(Dp, TD)                 # make the padded D divisible by TD
    x = batch.reshape(B, D)
    if Dp != D:
        x = jnp.pad(x, ((0, 0), (0, Dp - D)))
    grid_d = Dp // TD

    mixed_flat = pl.pallas_call(
        _mixup_batch_kernel,
        out_shape=jax.ShapeDtypeStruct((B, Dp), batch.dtype),
        grid_spec=pltpu.PrefetchScalarGridSpec(
            num_scalar_prefetch=1,
            grid=(grid_d,),
            in_specs=[pl.BlockSpec((B, TD), lambda j, lam_r: (0, j))],
            out_specs=pl.BlockSpec((B, TD), lambda j, lam_r: (0, j)),
        ),
        compiler_params=pltpu.CompilerParams(
            dimension_semantics=("parallel",)),
    )(lam, x)
    mixed = mixed_flat[:, :D].reshape(B, C, H, W)

    # ---- target path: one-hot + mix (tiny) ----
    tgt = target.astype(jnp.int32).reshape(B, 1)
    mixed_target = pl.pallas_call(
        _mixup_target_kernel,
        out_shape=jax.ShapeDtypeStruct((B, num_classes), batch.dtype),
        grid_spec=pltpu.PrefetchScalarGridSpec(
            num_scalar_prefetch=1,
            grid=(1,),
            in_specs=[pl.BlockSpec((B, 1), lambda i, lam_r: (0, 0))],
            out_specs=pl.BlockSpec((B, num_classes), lambda i, lam_r: (0, 0)),
        ),
        compiler_params=pltpu.CompilerParams(
            dimension_semantics=("arbitrary",)),
    )(lam, tgt)

    return mixed, mixed_target


# --------------------------------------------------------------------------
# main: deterministic example + pure-JAX reference check
# --------------------------------------------------------------------------
if __name__ == "__main__":
    key = jax.random.PRNGKey(0)
    kx, kt, kmix = jax.random.split(key, 3)

    B, C, H, W = 2, 4, 16, 16
    NUM_CLASSES = 10
    P, ALPHA = 0.5, 1.0

    batch = jax.random.normal(kx, (B, C, H, W), jnp.float32)
    target = jax.random.randint(kt, (B,), 0, NUM_CLASSES, jnp.int32)

    fwd = jax.jit(functools.partial(random_mixup, num_classes=NUM_CLASSES,
                                    p=P, alpha=ALPHA))
    mixed, mixed_target = fwd(batch, target, kmix)
    mixed = jax.block_until_ready(mixed)
    mixed_target = jax.block_until_ready(mixed_target)

    # shape / sanity checks
    assert mixed.shape == (B, C, H, W), mixed.shape
    assert mixed_target.shape == (B, NUM_CLASSES), mixed_target.shape
    assert bool(jnp.all(jnp.isfinite(mixed)))
    assert bool(jnp.all(jnp.isfinite(mixed_target)))
    # soft targets are a convex combination of one-hots -> rows sum to 1
    assert bool(jnp.allclose(mixed_target.sum(-1), 1.0, atol=1e-5))

    # pure-JAX reference (same lambda draw)
    lam_ref = _effective_lambda(kmix, P, ALPHA)
    oh = jax.nn.one_hot(target, NUM_CLASSES, dtype=batch.dtype)
    ref_batch = lam_ref * batch + (1.0 - lam_ref) * jnp.roll(batch, 1, axis=0)
    ref_target = lam_ref * oh + (1.0 - lam_ref) * jnp.roll(oh, 1, axis=0)
    assert bool(jnp.allclose(mixed, ref_batch, rtol=1e-5, atol=1e-5))
    assert bool(jnp.allclose(mixed_target, ref_target, rtol=1e-5, atol=1e-5))

    print("KERNEL_OK")
</pallas_src>

<mosaic_0001>
module attributes {stable_mosaic.version = 11 : i64} {
  func.func @_mixup_batch_kernel(%arg0: i32, %arg1: memref<1xf32, #tpu.memory_space<smem>>, %arg2: memref<2x1024xf32, #tpu.memory_space<vmem>>, %arg3: memref<2x1024xf32, #tpu.memory_space<vmem>>) attributes {dimension_semantics = [#tpu.dimension_semantics<parallel>], iteration_bounds = array<i64: 1>, scalar_prefetch = 1 : i64, scratch_operands = 0 : i64, tpu.core_type = #tpu.core_type<tc>, window_params = [{transform_indices = @transform_0, window_bounds = array<i64: 2, 1024>}, {transform_indices = @transform_1, window_bounds = array<i64: 2, 1024>}]} {
    %c0 = arith.constant 0 : index
    %0 = memref.load %arg1[%c0] : memref<1xf32, #tpu.memory_space<smem>>
    %c0_0 = arith.constant 0 : index
    %c0_1 = arith.constant 0 : index
    %1 = vector.load %arg2[%c0_0, %c0_1] : memref<2x1024xf32, #tpu.memory_space<vmem>>, vector<2x1024xf32>
    %2 = vector.extract_strided_slice %1 {offsets = [1, 0], sizes = [1, 1024], strides = [1, 1]} : vector<2x1024xf32> to vector<1x1024xf32>
    %3 = vector.extract_strided_slice %1 {offsets = [0, 0], sizes = [1, 1024], strides = [1, 1]} : vector<2x1024xf32> to vector<1x1024xf32>
    %4 = tpu.concatenate %2, %3 in 0 : vector<1x1024xf32>, vector<1x1024xf32> -> vector<2x1024xf32>
    %5 = vector.broadcast %0 : f32 to vector<2x1024xf32>
    %6 = arith.mulf %5, %1 : vector<2x1024xf32>
    %cst = arith.constant 1.000000e+00 : f32
    %7 = arith.subf %cst, %0 : f32
    %8 = vector.broadcast %7 : f32 to vector<2x1024xf32>
    %9 = arith.mulf %8, %4 : vector<2x1024xf32>
    %10 = arith.addf %6, %9 : vector<2x1024xf32>
    %c0_2 = arith.constant 0 : index
    %c0_3 = arith.constant 0 : index
    %11 = vector.load %arg3[%c0_2, %c0_3] : memref<2x1024xf32, #tpu.memory_space<vmem>>, vector<2x1024xf32>
    tpu.vector_store %arg3[%c0_2, %c0_3], %10 {strides = array<i32>} : memref<2x1024xf32, #tpu.memory_space<vmem>>, vector<2x1024xf32>,
    return
  }
  func.func @transform_0(%arg0: i32, %arg1: memref<1xf32, #tpu.memory_space<smem>>) -> (i32, i32) {
    %c0_i32 = arith.constant 0 : i32
    %c0_i32_0 = arith.constant 0 : i32
    return %c0_i32, %arg0 : i32, i32
  }
  func.func @transform_1(%arg0: i32, %arg1: memref<1xf32, #tpu.memory_space<smem>>) -> (i32, i32) {
    %c0_i32 = arith.constant 0 : i32
    %c0_i32_0 = arith.constant 0 : i32
    return %c0_i32, %arg0 : i32, i32
  }
}

module attributes {stable_mosaic.version = 11 : i64} {
  func.func @_mixup_target_kernel(%arg0: i32, %arg1: memref<1xf32, #tpu.memory_space<smem>>, %arg2: memref<2x1xi32, #tpu.memory_space<vmem>>, %arg3: memref<2x10xf32, #tpu.memory_space<vmem>>) attributes {dimension_semantics = [#tpu.dimension_semantics<arbitrary>], iteration_bounds = array<i64: 1>, scalar_prefetch = 1 : i64, scratch_operands = 0 : i64, tpu.core_type = #tpu.core_type<tc>, window_params = [{pipeline_mode = #tpu.pipeline_mode<synchronous>, transform_indices = @transform_0, window_bounds = array<i64: 2, 1>}, {pipeline_mode = #tpu.pipeline_mode<synchronous>, transform_indices = @transform_1, window_bounds = array<i64: 2, 10>}]} {
    %c0 = arith.constant 0 : index
    %0 = memref.load %arg1[%c0] : memref<1xf32, #tpu.memory_space<smem>>
    %c0_0 = arith.constant 0 : index
    %c0_1 = arith.constant 0 : index
    %1 = vector.load %arg2[%c0_0, %c0_1] : memref<2x1xi32, #tpu.memory_space<vmem>>, vector<2x1xi32>
    %2 = tpu.iota {dimensions = array<i32: 1>} : vector<2x10xi32>
    %3 = vector.broadcast %1 : vector<2x1xi32> to vector<2x10xi32>
    %4 = arith.cmpi eq, %2, %3 : vector<2x10xi32>
    %5 = arith.extui %4 : vector<2x10xi1> to vector<2x10xi32>
    %6 = arith.sitofp %5 : vector<2x10xi32> to vector<2x10xf32>
    %7 = vector.extract_strided_slice %6 {offsets = [1, 0], sizes = [1, 10], strides = [1, 1]} : vector<2x10xf32> to vector<1x10xf32>
    %8 = vector.extract_strided_slice %6 {offsets = [0, 0], sizes = [1, 10], strides = [1, 1]} : vector<2x10xf32> to vector<1x10xf32>
    %9 = tpu.concatenate %7, %8 in 0 : vector<1x10xf32>, vector<1x10xf32> -> vector<2x10xf32>
    %10 = vector.broadcast %0 : f32 to vector<2x10xf32>
    %11 = arith.mulf %10, %6 : vector<2x10xf32>
    %cst = arith.constant 1.000000e+00 : f32
    %12 = arith.subf %cst, %0 : f32
    %13 = vector.broadcast %12 : f32 to vector<2x10xf32>
    %14 = arith.mulf %13, %9 : vector<2x10xf32>
    %15 = arith.addf %11, %14 : vector<2x10xf32>
    %c0_2 = arith.constant 0 : index
    %c0_3 = arith.constant 0 : index
    %16 = vector.load %arg3[%c0_2, %c0_3] : memref<2x10xf32, #tpu.memory_space<vmem>>, vector<2x10xf32>
    tpu.vector_store %arg3[%c0_2, %c0_3], %15 {strides = array<i32>} : memref<2x10xf32, #tpu.memory_space<vmem>>, vector<2x10xf32>,
    return
  }
  func.func @transform_0(%arg0: i32, %arg1: memref<1xf32, #tpu.memory_space<smem>>) -> (i32, i32) {
    %c0_i32 = arith.constant 0 : i32
    %c0_i32_0 = arith.constant 0 : i32
    %c0_i32_1 = arith.constant 0 : i32
    return %c0_i32, %c0_i32_0 : i32, i32
  }
  func.func @transform_1(%arg0: i32, %arg1: memref<1xf32, #tpu.memory_space<smem>>) -> (i32, i32) {
    %c0_i32 = arith.constant 0 : i32
    %c0_i32_0 = arith.constant 0 : i32
    %c0_i32_1 = arith.constant 0 : i32
    return %c0_i32, %c0_i32_0 : i32, i32
  }
}

</mosaic_0001>

<bundles_post_ra>
// kernel: random_mixup.3
= control target key start
LH: loop header
LB: loop body
LE: loop exit
PB: predicated region body
PF: predicated region fallthrough
CT: control target
= control target key end

     0   :  { %v83_v1 = vmov 0   ;;  %s113_s0 = inlined_call_operand.<no memory space> [shape: f32[1], index: 0, kind: input, shape index: {}]   ;;  %s114_s1 = inlined_call_operand.vmem [shape: s32[2,1], index: 1, kind: input, shape index: {}]   ;;  %s115_s2 = inlined_call_operand.hbm [shape: f32[2,10], index: 2, kind: output, shape index: {}]  }
   0x1   :  { %v12_v0 = vld [vmem:[%s114_s1] sm:$0x3]  ;;  %56 = vset.pattern.permute.xlu0 %v83_v1 }
   0x2   :  { %8 = vsyncpa [#allocation5], 0  ;;  %16 = vperm.xlu0 %56, %v12_v0   ;;  %v13_v2 = vlaneseq  ;;  %s30_s13 = ssub.f32 1.0, %s113_s0  ;;  %vm26_vm1 = vcmask 1040384   ;;  %v84_v5 = vmov 0.0   ;;  %v28_v7 = vstv %s113_s0  ;;  %s85_s1 = smov [#allocation4]  }
   0x3   :  { %s41_s16 = sshll.u32 %s85_s1, 4  ;;  %s43_s19 = sshll.u32 %s115_s2, 4  ;;  %vm34_vm2 = vcmask 74752   ;;  %s42_s16 = int_to_ptr.vmem [resolvable:$true] %s41_s16  ;;  %s44_s19 = int_to_ptr.hbm [resolvable:$true] %s43_s19 }
   0x4   :  { %v14_v3 = vand.u32 127, %v13_v2  ;;  %v31_v10 = vstv %s30_s13 }
  0x74   :  { %v17_v4 = vpop.permute.xlu0 %16 }
  0x75   :  { %vm18_vm0 = vcmp.eq.s32.totalorder %v14_v3, %v17_v4 }
  0x76   :  { %v52_v6 = vsel %vm18_vm0, 1.0, %v84_v5 }
  0x77   :  { %v22_v8 = vrot.slane %v52_v6, 1  ;;  %v24_v9 = vrot.slane %v52_v6, 7  ;;  %v29_v12 = vmul.f32 %v52_v6, %v28_v7 }
  0x79   :  { %v27_v11 = vsel %vm26_vm1, %v22_v8, %v24_v9 }
  0x7a   :  { %v32_v13 = vmul.f32 %v31_v10, %v27_v11 }
  0x7c   :  { %v33_v14 = vadd.f32 %v32_v13, %v29_v12 }
  0x7e   :  { %35 = vst.msk [vmem:[#allocation4] sm:$0x3] %vm34_vm2, %v33_v14 }
  0x7f   :  { %46 = dma.vmem_to_hbm [thread:$0]  %s42_s16, 32, %s44_s19, [#allocation5]  }
  0x80   :  { %81 = dma.done.wait [#allocation5], 32  }
  0x81   :  { %82 = vsyncadd [#allocation5], 4294967264 }
  0x82   :  { %51 = vsyncpa [#allocation5], 1 }

// kernel: random_mixup.2
= control target key start
LH: loop header
LB: loop body
LE: loop exit
PB: predicated region body
PF: predicated region fallthrough
CT: control target
= control target key end

     0   :  { %vm47_vm0 = vcmask 1040384   ;;  %vm83_vm1 = vcmask 1041408   ;;  %vm85_vm2 = vcmask 1045508   ;;  %vm87_vm3 = vcmask 1043456   ;;  %s149_s0 = inlined_call_operand.<no memory space> [shape: f32[1], index: 0, kind: input, shape index: {}]   ;;  %s150_s1 = inlined_call_operand.vmem [shape: f32[2,1024], index: 1, kind: input, shape index: {}]   ;;  %s151_s2 = inlined_call_operand.vmem [shape: f32[2,1024], index: 2, kind: output, shape index: {}]  }
   0x1   :  { %v11_v0 = vld [vmem:[%s150_s1] sm:$0xff]  ;;  %v56_v1 = vstv %s149_s0  ;;  %s59_s15 = ssub.f32 1.0, %s149_s0  ;;  %v12_v2 = vld [vmem:[%s150_s1 + $0x8] sm:$0xff] }
   0x2   :  { %v15_v3 = vperm.slane %v11_v0, 1  ;;  %v16_v4 = vperm.slane %v11_v0, 3  ;;  %v17_v5 = vperm.slane %v11_v0, 5  ;;  %v18_v6 = vperm.slane %v11_v0, 7 }
   0x3   :  { %v31_v7 = vperm.slane %v11_v0, 0  ;;  %v32_v8 = vperm.slane %v11_v0, 2  ;;  %v33_v9 = vperm.slane %v11_v0, 4  ;;  %v34_v10 = vperm.slane %v11_v0, 6 }
   0x4   :  { %v57_v11 = vmul.f32 %v56_v1, %v11_v0  ;;  %v60_v12 = vstv %s59_s15  ;;  %v19_v13 = vperm.slane %v12_v2, 1  ;;  %v20_v14 = vperm.slane %v12_v2, 3 }
   0x5   :  { %v48_v15 = vsel %vm47_vm0, %v15_v3, %v31_v7  ;;  %v49_v16 = vsel %vm47_vm0, %v16_v4, %v32_v8  ;;  %v50_v17 = vsel %vm47_vm0, %v17_v5, %v33_v9  ;;  %v51_v18 = vsel %vm47_vm0, %v18_v6, %v34_v10 }
   0x6   :  { %v61_v19 = vmul.f32 %v60_v12, %v48_v15  ;;  %v62_v20 = vmul.f32 %v60_v12, %v49_v16  ;;  %v63_v21 = vmul.f32 %v60_v12, %v50_v17  ;;  %v64_v22 = vmul.f32 %v60_v12, %v51_v18 }
   0x7   :  { %v21_v23 = vperm.slane %v12_v2, 5  ;;  %v22_v24 = vperm.slane %v12_v2, 7  ;;  %v35_v25 = vperm.slane %v12_v2, 0  ;;  %v36_v26 = vperm.slane %v12_v2, 2 }
   0x8   :  { %v77_v27 = vrot.slane %v62_v20, 6  ;;  %v78_v28 = vrot.slane %v63_v21, 4  ;;  %v79_v29 = vrot.slane %v64_v22, 2  ;;  %v37_v30 = vperm.slane %v12_v2, 4 }
   0x9   :  { %v38_v31 = vperm.slane %v12_v2, 6  ;;  %v52_v32 = vsel %vm47_vm0, %v19_v13, %v35_v25  ;;  %v53_v33 = vsel %vm47_vm0, %v20_v14, %v36_v26  ;;  %v58_v46 = vmul.f32 %v56_v1, %v12_v2 }
   0xa   :  { %v84_v34 = vsel %vm83_vm1, %v61_v19, %v77_v27  ;;  %v86_v35 = vsel %vm85_vm2, %v78_v28, %v79_v29  ;;  %v54_v36 = vsel %vm47_vm0, %v21_v23, %v37_v30  ;;  %v65_v37 = vmul.f32 %v60_v12, %v52_v32 }
   0xb   :  { %v88_v38 = vsel %vm87_vm3, %v84_v34, %v86_v35  ;;  %v55_v39 = vsel %vm47_vm0, %v22_v24, %v38_v31  ;;  %v66_v40 = vmul.f32 %v60_v12, %v53_v33  ;;  %v67_v41 = vmul.f32 %v60_v12, %v54_v36 }
   0xc   :  { %v94_v42 = vadd.f32 %v88_v38, %v57_v11  ;;  %v68_v43 = vmul.f32 %v60_v12, %v55_v39 }
   0xd   :  { %v80_v44 = vrot.slane %v66_v40, 6  ;;  %v81_v45 = vrot.slane %v67_v41, 4 }
   0xe   :  { %96 = vst [vmem:[%s151_s2] sm:$0xff] %v94_v42  ;;  %v82_v47 = vrot.slane %v68_v43, 2 }
   0xf   :  { %v89_v48 = vsel %vm83_vm1, %v65_v37, %v80_v44 }
  0x10   :  { %v90_v49 = vsel %vm85_vm2, %v81_v45, %v82_v47 }
  0x11   :  { %v91_v50 = vsel %vm87_vm3, %v89_v48, %v90_v49 }
  0x12   :  { %v95_v51 = vadd.f32 %v91_v50, %v58_v46 }
  0x14   :  { %97 = vst [vmem:[%s151_s2 + $0x8] sm:$0xff] %v95_v51 }

</bundles_post_ra>
